<compile_context>
chip_gen: v7x
topology: tpu7x:2x2x1
jax: 0.10.0
libtpu: 0.0.40
codegen_flags: <defaults>
</compile_context>

<pallas_src>
import numpy as np
import jax
import jax.numpy as jnp
from jax.experimental import pallas as pl
from jax.experimental.pallas import tpu as pltpu


# ---------------------------------------------------------------------------
# host-side operator construction (numpy, executed once per weight/shape combo)
# ---------------------------------------------------------------------------

def _interp_matrix(n_in, n_out, mode):
    """1-D interpolation matrix U (n_out, n_in): up = U @ x along that axis."""
    U = np.zeros((n_out, n_in), np.float32)
    if mode == "nearest":                       # nn.Upsample(mode='nearest')
        src = np.minimum((np.arange(n_out) * n_in) // n_out, n_in - 1)
        U[np.arange(n_out), src] = 1.0
        return U
    # 'trilinear' (per-axis linear), align_corners=True  (module spec)
    if n_out == 1 or n_in == 1:
        U[:, 0] = 1.0
        return U
    s = np.arange(n_out) * (n_in - 1) / (n_out - 1)
    i0 = np.clip(np.floor(s).astype(np.int64), 0, n_in - 1)
    i1 = np.minimum(i0 + 1, n_in - 1)
    f = (s - i0).astype(np.float32)
    U[np.arange(n_out), i0] += 1.0 - f
    U[np.arange(n_out), i1] += f
    return U


def _shift_rows(U, k):
    """Conv-tap-shifted operator: S[o,:] = U[o+k-1,:], zero rows where out of range.

    Folds the zero padding (padding=1) of the 3-tap conv into the upsample operator, so
    the kernel needs no halo buffer and never multiplies explicit zeros from a pad."""
    S = np.zeros_like(U)
    src = np.arange(U.shape[0]) + (k - 1)
    ok = (src >= 0) & (src < U.shape[0])
    S[ok] = U[src[ok]]
    return S


# ---------------------------------------------------------------------------
# fused Pallas kernel: upsample + 3x3x3 conv (taps folded into operators) + bias + ReLU
# ---------------------------------------------------------------------------

def _fused_kernel(x_ref, wf_ref, ul_ref, b_ref, o_ref, r_ref):
    dh = x_ref.shape[0]          # D*H
    n_taps = wf_ref.shape[0]     # 9 = 3(kd) * 3(kh)

    # stage 1: per (kd,kh) tap -- upsample-along-W + kw taps + Cin contraction folded into
    #          wfold; results staged in a bf16 VMEM scratch (bounded live ranges, no SSA
    #          accumulator, lane-dense sublane-aligned stores).
    xb = x_ref[...].astype(jnp.bfloat16)                                   # (D*H, W*Cin)
    for t in range(n_taps):                                                # unrolled (9)
        r_ref[pl.ds(t * dh, dh), :] = jnp.dot(
            xb, wf_ref[t], preferred_element_type=jnp.float32
        ).astype(jnp.bfloat16)

    # stage 2: ONE big-K matmul (K = 9*D*H) folds upsample-along-D/H + all kd/kh taps; the
    #          9-tap conv reduction happens inside the MXU accumulation.
    acc = jnp.dot(ul_ref[...], r_ref[...], preferred_element_type=jnp.float32)

    # stage 3: bias + ReLU, lane-dense f32 store (last dim = Wo*Cout, 128 here).
    o_ref[...] = jnp.maximum(acc + b_ref[...], 0.0)


def _build_forward(w_np, b_np, N, Cin, Cout, D, H, W, scale, mode):
    Do, Ho, Wo = scale * D, scale * H, scale * W
    DH, WC = D * H, W * Cin
    DoHo, WoCout = Do * Ho, Wo * Cout

    Ud = _interp_matrix(D, Do, mode)
    Uh = _interp_matrix(H, Ho, mode)
    Uw = _interp_matrix(W, Wo, mode)

    # ul_all[(do,ho), t*DH + d*H + h] = Ud_shift[kd][do,d] * Uh_shift[kh][ho,h],  t = kd*3+kh
    ul_np = np.concatenate(
        [np.kron(_shift_rows(Ud, kd), _shift_rows(Uh, kh))
         for kd in range(3) for kh in range(3)], axis=1)                   # (DoHo, 9*DH)

    # wfold[t, w*Cin+c, wo*Cout+co] = sum_kw Uw_shift[kw][wo,w] * w[co,c,kd,kh,kw]
    Uw_s = np.stack([_shift_rows(Uw, kw) for kw in range(3)])              # (3, Wo, W)
    wf_np = np.einsum('kqw,ocdhk->dhwcqo', Uw_s, w_np)                     # (3,3,W,Cin,Wo,Cout)
    wf_np = wf_np.reshape(9, WC, WoCout)

    ul = jnp.asarray(ul_np, jnp.bfloat16)                                  # bf16 MXU operands
    wf = jnp.asarray(wf_np, jnp.bfloat16)
    btile = jnp.asarray(np.tile(b_np, Wo).reshape(1, WoCout), jnp.float32)

    # row-block the output: >=2 independent "parallel" steps even for N=1 (v7x: 2 TensorCores)
    RBM = 128 if (DoHo % 128 == 0 and DoHo >= 256) else DoHo
    n_rb = DoHo // RBM

    call = pl.pallas_call(
        _fused_kernel,
        out_shape=jax.ShapeDtypeStruct((N, DoHo, WoCout), jnp.float32),
        grid=(N, n_rb),
        in_specs=[
            pl.BlockSpec((None, DH, WC), lambda n, rb: (n, 0, 0)),         # x (per batch)
            pl.BlockSpec((9, WC, WoCout), lambda n, rb: (0, 0, 0)),        # wfold (resident)
            pl.BlockSpec((RBM, 9 * DH), lambda n, rb: (rb, 0)),            # ul row block
            pl.BlockSpec((1, WoCout), lambda n, rb: (0, 0)),               # bias tile
        ],
        out_specs=pl.BlockSpec((None, RBM, WoCout), lambda n, rb: (n, rb, 0)),
        scratch_shapes=[pltpu.VMEM((9 * DH, WoCout), jnp.bfloat16)],       # bf16 staging buffer
        compiler_params=pltpu.CompilerParams(
            dimension_semantics=("parallel", "parallel"),
            vmem_limit_bytes=16 * 1024 * 1024),
    )

    @jax.jit
    def forward(x_ncdhw, wf_, ul_, btile_):
        # NCDHW -> NDHWC -> merged (N, D*H, W*Cin) slab (module-boundary layout plumbing)
        x2d = jnp.transpose(x_ncdhw, (0, 2, 3, 4, 1)).reshape(N, DH, WC)
        out2d = call(x2d, wf_, ul_, btile_)                                # (N, DoHo, WoCout)
        out = out2d.reshape(N, Do, Ho, Wo, Cout)
        return jnp.transpose(out, (0, 4, 1, 2, 3))                         # back to NCDHW

    return lambda x: forward(x, wf, ul, btile)


def make_upsampling_forward(w_torch, bias, scale=2, mode="trilinear"):
    """Upsample(scale, mode) -> Conv3d(3, pad=1) -> ReLU.  Operator prep runs once (cached)."""
    w_np = np.asarray(w_torch, np.float32)
    b_np = np.asarray(bias, np.float32)
    Cout, Cin = int(w_np.shape[0]), int(w_np.shape[1])
    cache = {}

    def forward(x_ncdhw):
        N, C, D, H, W = x_ncdhw.shape
        assert C == Cin
        key = (int(N), int(D), int(H), int(W))
        if key not in cache:
            cache[key] = _build_forward(w_np, b_np, *key[:1], Cin, Cout, *key[1:], scale, mode)
        return cache[key](x_ncdhw)

    return forward


# ---------------------------------------------------------------------------
# pure-JAX f32 reference (independent code path: per-axis einsums + explicit pad + 27 taps)
# ---------------------------------------------------------------------------

def upsampling_reference(x_ncdhw, w_torch, bias, scale=2, mode="trilinear"):
    N, Cin, D, H, W = x_ncdhw.shape
    Cout = w_torch.shape[0]
    Do, Ho, Wo = scale * D, scale * H, scale * W
    x = jnp.transpose(x_ncdhw, (0, 2, 3, 4, 1))
    Ud = jnp.asarray(_interp_matrix(D, Do, mode))
    Uh = jnp.asarray(_interp_matrix(H, Ho, mode))
    Uw = jnp.asarray(_interp_matrix(W, Wo, mode))
    u = jnp.einsum('od,ndhwc->nohwc', Ud, x, precision='highest')
    u = jnp.einsum('ph,nohwc->nopwc', Uh, u, precision='highest')
    u = jnp.einsum('qw,nopwc->nopqc', Uw, u, precision='highest')
    up = jnp.pad(u, ((0, 0), (1, 1), (1, 1), (1, 1), (0, 0)))
    acc = jnp.zeros((N, Do, Ho, Wo, Cout), jnp.float32)
    for kd in range(3):
        for kh in range(3):
            for kw in range(3):
                win = up[:, kd:kd + Do, kh:kh + Ho, kw:kw + Wo, :]
                acc = acc + jnp.einsum('ndhwc,oc->ndhwo', win,
                                       w_torch[:, :, kd, kh, kw], precision='highest')
    y = jnp.maximum(acc + bias[None, None, None, None, :], 0.0)
    return jnp.transpose(y, (0, 4, 1, 2, 3))


# ---------------------------------------------------------------------------
# main
# ---------------------------------------------------------------------------

if __name__ == "__main__":
    key = jax.random.PRNGKey(0)
    N, Cin, D, H, W = 2, 4, 8, 8, 8        # small shapes; stride=2 -> 16^3 output volume
    Cout, stride = 8, 2
    kx, kw, kb = jax.random.split(key, 3)

    x_ncdhw = jax.random.normal(kx, (N, Cin, D, H, W), jnp.float32)            # PyTorch layout
    w_torch = jax.random.normal(kw, (Cout, Cin, 3, 3, 3), jnp.float32) / np.sqrt(27.0 * Cin)
    bias = 0.1 * jax.random.normal(kb, (Cout,), jnp.float32)

    for mode in ("trilinear", "nearest"):   # mode_upsampling = 1 and 2
        fwd = make_upsampling_forward(w_torch, bias, scale=stride, mode=mode)
        y = jax.block_until_ready(fwd(x_ncdhw))
        y_ref = upsampling_reference(x_ncdhw, w_torch, bias, scale=stride, mode=mode)
        np.testing.assert_allclose(np.asarray(y), np.asarray(y_ref), rtol=3e-2, atol=3e-2)
        assert y.shape == (N, Cout, stride * D, stride * H, stride * W)

    print("KERNEL_OK")
</pallas_src>

<mosaic_0001>
module attributes {stable_mosaic.version = 11 : i64} {
  func.func @_fused_kernel(%arg0: i32, %arg1: i32, %arg2: memref<1x64x32xf32, #tpu.memory_space<vmem>>, %arg3: memref<9x32x128xbf16, #tpu.memory_space<vmem>>, %arg4: memref<128x576xbf16, #tpu.memory_space<vmem>>, %arg5: memref<1x128xf32, #tpu.memory_space<vmem>>, %arg6: memref<1x128x128xf32, #tpu.memory_space<vmem>>, %arg7: memref<576x128xbf16, #tpu.memory_space<vmem>>) attributes {dimension_semantics = [#tpu.dimension_semantics<parallel>, #tpu.dimension_semantics<parallel>], iteration_bounds = array<i64: 2, 2>, scalar_prefetch = 0 : i64, scratch_operands = 1 : i64, tpu.core_type = #tpu.core_type<tc>, window_params = [{transform_indices = @transform_0, window_bounds = array<i64: 1, 64, 32>}, {pipeline_mode = #tpu.pipeline_mode<synchronous>, transform_indices = @transform_1, window_bounds = array<i64: 9, 32, 128>}, {transform_indices = @transform_2, window_bounds = array<i64: 128, 576>}, {pipeline_mode = #tpu.pipeline_mode<synchronous>, transform_indices = @transform_3, window_bounds = array<i64: 1, 128>}, {transform_indices = @transform_4, window_bounds = array<i64: 1, 128, 128>}]} {
    %c0 = arith.constant 0 : index
    %c0_0 = arith.constant 0 : index
    %c0_1 = arith.constant 0 : index
    %0 = vector.load %arg2[%c0, %c0_0, %c0_1] : memref<1x64x32xf32, #tpu.memory_space<vmem>>, vector<1x64x32xf32>
    %1 = vector.shape_cast %0 : vector<1x64x32xf32> to vector<64x32xf32>
    %2 = arith.truncf %1 : vector<64x32xf32> to vector<64x32xbf16>
    %c0_2 = arith.constant 0 : index
    %c0_3 = arith.constant 0 : index
    %c0_4 = arith.constant 0 : index
    %3 = vector.load %arg3[%c0_2, %c0_3, %c0_4] : memref<9x32x128xbf16, #tpu.memory_space<vmem>>, vector<1x32x128xbf16>
    %4 = vector.shape_cast %3 : vector<1x32x128xbf16> to vector<32x128xbf16>
    %cst = arith.constant dense<0.000000e+00> : vector<64x128xf32>
    %5 = tpu.matmul %2, %4, %cst {dimension_numbers = #tpu.dot_dimension_numbers<[1], [0], [0], [1], [0, 0, 1, 1], [], []>} : vector<64x32xbf16>, vector<32x128xbf16>, vector<64x128xf32> -> vector<64x128xf32>
    %6 = arith.truncf %5 : vector<64x128xf32> to vector<64x128xbf16>
    %c0_5 = arith.constant 0 : index
    %c0_6 = arith.constant 0 : index
    %7 = vector.load %arg7[%c0_5, %c0_6] : memref<576x128xbf16, #tpu.memory_space<vmem>>, vector<64x128xbf16>
    tpu.vector_store %arg7[%c0_5, %c0_6], %6 {strides = array<i32>} : memref<576x128xbf16, #tpu.memory_space<vmem>>, vector<64x128xbf16>,
    %c1 = arith.constant 1 : index
    %c0_7 = arith.constant 0 : index
    %c0_8 = arith.constant 0 : index
    %8 = vector.load %arg3[%c1, %c0_7, %c0_8] : memref<9x32x128xbf16, #tpu.memory_space<vmem>>, vector<1x32x128xbf16>
    %9 = vector.shape_cast %8 : vector<1x32x128xbf16> to vector<32x128xbf16>
    %cst_9 = arith.constant dense<0.000000e+00> : vector<64x128xf32>
    %10 = tpu.matmul %2, %9, %cst_9 {dimension_numbers = #tpu.dot_dimension_numbers<[1], [0], [0], [1], [0, 0, 1, 1], [], []>} : vector<64x32xbf16>, vector<32x128xbf16>, vector<64x128xf32> -> vector<64x128xf32>
    %11 = arith.truncf %10 : vector<64x128xf32> to vector<64x128xbf16>
    %c64 = arith.constant 64 : index
    %c0_10 = arith.constant 0 : index
    %12 = vector.load %arg7[%c64, %c0_10] : memref<576x128xbf16, #tpu.memory_space<vmem>>, vector<64x128xbf16>
    tpu.vector_store %arg7[%c64, %c0_10], %11 {strides = array<i32>} : memref<576x128xbf16, #tpu.memory_space<vmem>>, vector<64x128xbf16>,
    %c2 = arith.constant 2 : index
    %c0_11 = arith.constant 0 : index
    %c0_12 = arith.constant 0 : index
    %13 = vector.load %arg3[%c2, %c0_11, %c0_12] : memref<9x32x128xbf16, #tpu.memory_space<vmem>>, vector<1x32x128xbf16>
    %14 = vector.shape_cast %13 : vector<1x32x128xbf16> to vector<32x128xbf16>
    %cst_13 = arith.constant dense<0.000000e+00> : vector<64x128xf32>
    %15 = tpu.matmul %2, %14, %cst_13 {dimension_numbers = #tpu.dot_dimension_numbers<[1], [0], [0], [1], [0, 0, 1, 1], [], []>} : vector<64x32xbf16>, vector<32x128xbf16>, vector<64x128xf32> -> vector<64x128xf32>
    %16 = arith.truncf %15 : vector<64x128xf32> to vector<64x128xbf16>
    %c128 = arith.constant 128 : index
    %c0_14 = arith.constant 0 : index
    %17 = vector.load %arg7[%c128, %c0_14] : memref<576x128xbf16, #tpu.memory_space<vmem>>, vector<64x128xbf16>
    tpu.vector_store %arg7[%c128, %c0_14], %16 {strides = array<i32>} : memref<576x128xbf16, #tpu.memory_space<vmem>>, vector<64x128xbf16>,
    %c3 = arith.constant 3 : index
    %c0_15 = arith.constant 0 : index
    %c0_16 = arith.constant 0 : index
    %18 = vector.load %arg3[%c3, %c0_15, %c0_16] : memref<9x32x128xbf16, #tpu.memory_space<vmem>>, vector<1x32x128xbf16>
    %19 = vector.shape_cast %18 : vector<1x32x128xbf16> to vector<32x128xbf16>
    %cst_17 = arith.constant dense<0.000000e+00> : vector<64x128xf32>
    %20 = tpu.matmul %2, %19, %cst_17 {dimension_numbers = #tpu.dot_dimension_numbers<[1], [0], [0], [1], [0, 0, 1, 1], [], []>} : vector<64x32xbf16>, vector<32x128xbf16>, vector<64x128xf32> -> vector<64x128xf32>
    %21 = arith.truncf %20 : vector<64x128xf32> to vector<64x128xbf16>
    %c192 = arith.constant 192 : index
    %c0_18 = arith.constant 0 : index
    %22 = vector.load %arg7[%c192, %c0_18] : memref<576x128xbf16, #tpu.memory_space<vmem>>, vector<64x128xbf16>
    tpu.vector_store %arg7[%c192, %c0_18], %21 {strides = array<i32>} : memref<576x128xbf16, #tpu.memory_space<vmem>>, vector<64x128xbf16>,
    %c4 = arith.constant 4 : index
    %c0_19 = arith.constant 0 : index
    %c0_20 = arith.constant 0 : index
    %23 = vector.load %arg3[%c4, %c0_19, %c0_20] : memref<9x32x128xbf16, #tpu.memory_space<vmem>>, vector<1x32x128xbf16>
    %24 = vector.shape_cast %23 : vector<1x32x128xbf16> to vector<32x128xbf16>
    %cst_21 = arith.constant dense<0.000000e+00> : vector<64x128xf32>
    %25 = tpu.matmul %2, %24, %cst_21 {dimension_numbers = #tpu.dot_dimension_numbers<[1], [0], [0], [1], [0, 0, 1, 1], [], []>} : vector<64x32xbf16>, vector<32x128xbf16>, vector<64x128xf32> -> vector<64x128xf32>
    %26 = arith.truncf %25 : vector<64x128xf32> to vector<64x128xbf16>
    %c256 = arith.constant 256 : index
    %c0_22 = arith.constant 0 : index
    %27 = vector.load %arg7[%c256, %c0_22] : memref<576x128xbf16, #tpu.memory_space<vmem>>, vector<64x128xbf16>
    tpu.vector_store %arg7[%c256, %c0_22], %26 {strides = array<i32>} : memref<576x128xbf16, #tpu.memory_space<vmem>>, vector<64x128xbf16>,
    %c5 = arith.constant 5 : index
    %c0_23 = arith.constant 0 : index
    %c0_24 = arith.constant 0 : index
    %28 = vector.load %arg3[%c5, %c0_23, %c0_24] : memref<9x32x128xbf16, #tpu.memory_space<vmem>>, vector<1x32x128xbf16>
    %29 = vector.shape_cast %28 : vector<1x32x128xbf16> to vector<32x128xbf16>
    %cst_25 = arith.constant dense<0.000000e+00> : vector<64x128xf32>
    %30 = tpu.matmul %2, %29, %cst_25 {dimension_numbers = #tpu.dot_dimension_numbers<[1], [0], [0], [1], [0, 0, 1, 1], [], []>} : vector<64x32xbf16>, vector<32x128xbf16>, vector<64x128xf32> -> vector<64x128xf32>
    %31 = arith.truncf %30 : vector<64x128xf32> to vector<64x128xbf16>
    %c320 = arith.constant 320 : index
    %c0_26 = arith.constant 0 : index
    %32 = vector.load %arg7[%c320, %c0_26] : memref<576x128xbf16, #tpu.memory_space<vmem>>, vector<64x128xbf16>
    tpu.vector_store %arg7[%c320, %c0_26], %31 {strides = array<i32>} : memref<576x128xbf16, #tpu.memory_space<vmem>>, vector<64x128xbf16>,
    %c6 = arith.constant 6 : index
    %c0_27 = arith.constant 0 : index
    %c0_28 = arith.constant 0 : index
    %33 = vector.load %arg3[%c6, %c0_27, %c0_28] : memref<9x32x128xbf16, #tpu.memory_space<vmem>>, vector<1x32x128xbf16>
    %34 = vector.shape_cast %33 : vector<1x32x128xbf16> to vector<32x128xbf16>
    %cst_29 = arith.constant dense<0.000000e+00> : vector<64x128xf32>
    %35 = tpu.matmul %2, %34, %cst_29 {dimension_numbers = #tpu.dot_dimension_numbers<[1], [0], [0], [1], [0, 0, 1, 1], [], []>} : vector<64x32xbf16>, vector<32x128xbf16>, vector<64x128xf32> -> vector<64x128xf32>
    %36 = arith.truncf %35 : vector<64x128xf32> to vector<64x128xbf16>
    %c384 = arith.constant 384 : index
    %c0_30 = arith.constant 0 : index
    %37 = vector.load %arg7[%c384, %c0_30] : memref<576x128xbf16, #tpu.memory_space<vmem>>, vector<64x128xbf16>
    tpu.vector_store %arg7[%c384, %c0_30], %36 {strides = array<i32>} : memref<576x128xbf16, #tpu.memory_space<vmem>>, vector<64x128xbf16>,
    %c7 = arith.constant 7 : index
    %c0_31 = arith.constant 0 : index
    %c0_32 = arith.constant 0 : index
    %38 = vector.load %arg3[%c7, %c0_31, %c0_32] : memref<9x32x128xbf16, #tpu.memory_space<vmem>>, vector<1x32x128xbf16>
    %39 = vector.shape_cast %38 : vector<1x32x128xbf16> to vector<32x128xbf16>
    %cst_33 = arith.constant dense<0.000000e+00> : vector<64x128xf32>
    %40 = tpu.matmul %2, %39, %cst_33 {dimension_numbers = #tpu.dot_dimension_numbers<[1], [0], [0], [1], [0, 0, 1, 1], [], []>} : vector<64x32xbf16>, vector<32x128xbf16>, vector<64x128xf32> -> vector<64x128xf32>
    %41 = arith.truncf %40 : vector<64x128xf32> to vector<64x128xbf16>
    %c448 = arith.constant 448 : index
    %c0_34 = arith.constant 0 : index
    %42 = vector.load %arg7[%c448, %c0_34] : memref<576x128xbf16, #tpu.memory_space<vmem>>, vector<64x128xbf16>
    tpu.vector_store %arg7[%c448, %c0_34], %41 {strides = array<i32>} : memref<576x128xbf16, #tpu.memory_space<vmem>>, vector<64x128xbf16>,
    %c8 = arith.constant 8 : index
    %c0_35 = arith.constant 0 : index
    %c0_36 = arith.constant 0 : index
    %43 = vector.load %arg3[%c8, %c0_35, %c0_36] : memref<9x32x128xbf16, #tpu.memory_space<vmem>>, vector<1x32x128xbf16>
    %44 = vector.shape_cast %43 : vector<1x32x128xbf16> to vector<32x128xbf16>
    %cst_37 = arith.constant dense<0.000000e+00> : vector<64x128xf32>
    %45 = tpu.matmul %2, %44, %cst_37 {dimension_numbers = #tpu.dot_dimension_numbers<[1], [0], [0], [1], [0, 0, 1, 1], [], []>} : vector<64x32xbf16>, vector<32x128xbf16>, vector<64x128xf32> -> vector<64x128xf32>
    %46 = arith.truncf %45 : vector<64x128xf32> to vector<64x128xbf16>
    %c512 = arith.constant 512 : index
    %c0_38 = arith.constant 0 : index
    %47 = vector.load %arg7[%c512, %c0_38] : memref<576x128xbf16, #tpu.memory_space<vmem>>, vector<64x128xbf16>
    tpu.vector_store %arg7[%c512, %c0_38], %46 {strides = array<i32>} : memref<576x128xbf16, #tpu.memory_space<vmem>>, vector<64x128xbf16>,
    %c0_39 = arith.constant 0 : index
    %c0_40 = arith.constant 0 : index
    %48 = vector.load %arg4[%c0_39, %c0_40] : memref<128x576xbf16, #tpu.memory_space<vmem>>, vector<128x576xbf16>
    %c0_41 = arith.constant 0 : index
    %c0_42 = arith.constant 0 : index
    %49 = vector.load %arg7[%c0_41, %c0_42] : memref<576x128xbf16, #tpu.memory_space<vmem>>, vector<576x128xbf16>
    %cst_43 = arith.constant dense<0.000000e+00> : vector<128x128xf32>
    %50 = tpu.matmul %48, %49, %cst_43 {dimension_numbers = #tpu.dot_dimension_numbers<[1], [0], [0], [1], [0, 0, 1, 1], [], []>} : vector<128x576xbf16>, vector<576x128xbf16>, vector<128x128xf32> -> vector<128x128xf32>
    %c0_44 = arith.constant 0 : index
    %c0_45 = arith.constant 0 : index
    %51 = vector.load %arg5[%c0_44, %c0_45] : memref<1x128xf32, #tpu.memory_space<vmem>>, vector<1x128xf32>
    %52 = vector.broadcast %51 : vector<1x128xf32> to vector<128x128xf32>
    %53 = arith.addf %50, %52 : vector<128x128xf32>
    %cst_46 = arith.constant 0.000000e+00 : f32
    %54 = vector.broadcast %cst_46 : f32 to vector<128x128xf32>
    %55 = arith.maximumf %53, %54 : vector<128x128xf32>
    %c0_47 = arith.constant 0 : index
    %c0_48 = arith.constant 0 : index
    %c0_49 = arith.constant 0 : index
    %56 = vector.load %arg6[%c0_47, %c0_48, %c0_49] : memref<1x128x128xf32, #tpu.memory_space<vmem>>, vector<1x128x128xf32>
    %57 = vector.shape_cast %56 : vector<1x128x128xf32> to vector<128x128xf32>
    %58 = vector.shape_cast %55 : vector<128x128xf32> to vector<1x128x128xf32>
    tpu.vector_store %arg6[%c0_47, %c0_48, %c0_49], %58 {strides = array<i32>} : memref<1x128x128xf32, #tpu.memory_space<vmem>>, vector<1x128x128xf32>,
    return
  }
  func.func @transform_0(%arg0: i32, %arg1: i32) -> (i32, i32, i32) {
    %c0_i32 = arith.constant 0 : i32
    %c0_i32_0 = arith.constant 0 : i32
    %c0_i32_1 = arith.constant 0 : i32
    return %arg0, %c0_i32, %c0_i32_0 : i32, i32, i32
  }
  func.func @transform_1(%arg0: i32, %arg1: i32) -> (i32, i32, i32) {
    %c0_i32 = arith.constant 0 : i32
    %c0_i32_0 = arith.constant 0 : i32
    %c0_i32_1 = arith.constant 0 : i32
    %c0_i32_2 = arith.constant 0 : i32
    return %c0_i32, %c0_i32_0, %c0_i32_1 : i32, i32, i32
  }
  func.func @transform_2(%arg0: i32, %arg1: i32) -> (i32, i32) {
    %c0_i32 = arith.constant 0 : i32
    %c0_i32_0 = arith.constant 0 : i32
    return %arg1, %c0_i32 : i32, i32
  }
  func.func @transform_3(%arg0: i32, %arg1: i32) -> (i32, i32) {
    %c0_i32 = arith.constant 0 : i32
    %c0_i32_0 = arith.constant 0 : i32
    %c0_i32_1 = arith.constant 0 : i32
    return %c0_i32, %c0_i32_0 : i32, i32
  }
  func.func @transform_4(%arg0: i32, %arg1: i32) -> (i32, i32, i32) {
    %c0_i32 = arith.constant 0 : i32
    %c0_i32_0 = arith.constant 0 : i32
    return %arg0, %arg1, %c0_i32 : i32, i32, i32
  }
}

</mosaic_0001>

<bundles_post_ra>
// kernel: forward.1
= control target key start
LH: loop header
LB: loop body
LE: loop exit
PB: predicated region body
PF: predicated region fallthrough
CT: control target
= control target key end

     0   :  { %9 = vsyncpa [#allocation4], 0  ;;  %s2997_s0 = inlined_call_operand.vmem [shape: f32[2,64,32], index: 0, kind: input, shape index: {}]   ;;  %s2998_s1 = inlined_call_operand.hbm [shape: bf16[9,32,128], index: 1, kind: input, shape index: {}]   ;;  %s2999_s2 = inlined_call_operand.vmem [shape: bf16[256,576], index: 2, kind: input, shape index: {}]   ;;  %s3000_s3 = inlined_call_operand.hbm [shape: f32[1,128], index: 3, kind: input, shape index: {}]   ;;  %s3001_s4 = inlined_call_operand.vmem [shape: f32[2,256,128], index: 4, kind: output, shape index: {}]  }
   0x1   :  { %10 = vsyncpa [#allocation6], 0  ;;  %s2589_s15 = smov 0   ;;  %s2591_s16 = smov 0  }
   0x2   :  { %s2593_s17 = smov 0   ;;  %s2595_s18 = smov 0  }
   0x3   :  { %s2597_s19 = smov 0  }
   0x4 LB: > { %s1866_s20 = sadd.s32 4294967295, %s2558_s19   ;;  %s25_s21 = sadd.s32 1, %s2550_s17  ;;  %s2558_s19 = sphi %s2597_s19, %s16_s19   ;;  %s2554_s18 = sphi %s2595_s18, %s3013_s18   ;;  %s2550_s17 = sphi %s2593_s17, %s3012_s17   ;;  %s2546_s16 = sphi %s2591_s16, %s3011_s16   ;;  %s2542_s15 = sphi %s2589_s15, %s3010_s15  }
   0x5   : > { %p26_p0 = scmp.ge.s32.totalorder %s25_s21, 2  ;;  %s28_s22 = sadd.s32 1, %s2554_s18 }
   0x6   : > { %p1868_p1 = scmp.ge.s32.totalorder %s2558_s19, 1  ;;  %p155_p2 = scmp.lt.s32.totalorder %s2558_s19, 5 }
   0x7   : > { %s3015_s21 = smov (%p26_p0, %s25_s21), 0  ;;  %s3017_s22 = smov (!%p26_p0, %s28_s22), %s2554_s18 }
   0x8   : > { %p2622_p3 = pnand %p1868_p1, %p155_p2  ;;  %p30_p4 = scmp.ge.s32.totalorder %s3017_s22, 2 }
   0x9   : > { %p2626_p5 = scmp.eq.s32.totalorder %s1866_s20, 0  ;;  %s2560_s25 = smov [#allocation3]  }
   0xa   : > { %s3005_s23 = scalar_select %p2622_p3, 1, 0 }
   0xb   : > { %s3006_s24 = scalar_select %p2626_p5, 1, 0 }
   0xc   : > { %p2327_p6 = pneg %p2622_p3  ;;  %s3019_s22 = smov (%p30_p4, %s3017_s22), 0 }
   0xd   : > { %s167_s26 = sshll.u32 %s2560_s25, 4  ;;  %s2456_s30 = scalar_lea.hbm %s2998_s1, 2304  ;;  %s168_s26 = int_to_ptr.vmem [resolvable:$true] %s167_s26 }
   0xe   : > { %p2636_p7 = pnand %p2626_p5, %p2327_p6  ;;  %p2457_p8 = scmp.ne.s32.totalorder %s2998_s1, %s2456_s30 }
   0xf   : > { %p2463_p12 = scmp.lt.u32.totalorder %s2456_s30, %s2998_s1 }
  0x10   : > { %p2458_p9 = pneg %p2636_p7 }
  0x12   : > { %p2459_p10 = pnand %p2458_p9, %p2457_p8 }
  0x14   : > { %p2460_p11 = pneg %p2459_p10 }
  0x16   : > { %p2465_p13 = pnand %p2463_p12, %p2460_p11 }
  0x18   : > { %2468 = shalt.err (!%p2465_p13)
}
  0x19   : > { %s2469_s9 = scalar_lea.vmem %s168_s26, 2304  ;;  %p2477_p4 = scmp.lt.s32.totalorder %s168_s26, %s168_s26 }
  0x1a   : > { %p2470_p0 = scmp.ne.s32.totalorder %s168_s26, %s2469_s9  ;;  %p2478_p6 = scmp.lt.s32.totalorder %s2469_s9, %s2469_s9 }
  0x1c   : > { %p2472_p1 = pnand %p2470_p0, %p2458_p9  ;;  %p2479_p5 = por %p2478_p6, %p2477_p4 }
  0x1e   : > { %p2473_p2 = pneg %p2472_p1 }
  0x20   : > { %p2480_p3 = pnand %p2479_p5, %p2473_p2 }
  0x22   : > { %2483 = shalt.err (!%p2480_p3)
}
  0x23   : > { %s2561_s10 = smov 64   ;;  %s2562_s11 = smov 4  }
  0x24   : > { %2330 = dma.hbm_to_vmem [thread:$0]  (!%p2636_p7), %s2998_s1, 2304, %s168_s26, [#allocation4], %s2561_s10, %s2561_s10, %s2562_s11  }
  0x25   : > { %s2563_s14 = smov [#allocation5]   ;;  %s2484_s29 = scalar_lea.hbm %s3000_s3, 16 }
  0x26   : > { %s181_s20 = sshll.u32 %s2563_s14, 4  ;;  %p2485_p3 = scmp.ne.s32.totalorder %s3000_s3, %s2484_s29  ;;  %s182_s20 = int_to_ptr.vmem [resolvable:$true] %s181_s20 }
  0x27   : > { %p2491_p10 = scmp.lt.u32.totalorder %s2484_s29, %s3000_s3 }
  0x28   : > { %p2487_p5 = pnand %p2485_p3, %p2458_p9 }
  0x2a   : > { %p2488_p8 = pneg %p2487_p5 }
  0x2c   : > { %p2493_p11 = pnand %p2491_p10, %p2488_p8 }
  0x2e   : > { %2496 = shalt.err (!%p2493_p11)
}
  0x2f   : > { %s2497_s26 = scalar_lea.vmem %s182_s20, 16  ;;  %s2504_s8 = scalar_lea.vmem %s182_s20, 32 }
  0x30   : > { %p2498_p12 = scmp.ne.s32.totalorder %s182_s20, %s2497_s26  ;;  %p2505_p1 = scmp.lt.s32.totalorder %s182_s20, %s182_s20 }
  0x31   : > { %p2506_p2 = scmp.lt.s32.totalorder %s2504_s8, %s2497_s26 }
  0x32   : > { %p2500_p13 = pnand %p2498_p12, %p2458_p9 }
  0x33   : > { %p2507_p4 = por %p2506_p2, %p2505_p1 }
  0x34   : > { %p2501_p0 = pneg %p2500_p13 }
  0x36   : > { %p2508_p6 = pnand %p2507_p4, %p2501_p0 }
  0x38   : > { %2511 = shalt.err (!%p2508_p6)
}
  0x39   : > { %2333 = dma.hbm_to_vmem [thread:$0]  (!%p2636_p7), %s3000_s3, 16, %s182_s20, [#allocation6]  }
  0x3a   : > { %p3008_p3 = scmp.ne.s32.totalorder %s3005_s23, 0 }
  0x3b   : > { %p3009_p5 = scmp.ne.s32.totalorder (!%p3008_p3), %s3006_s24, 0 }
  0x3c   : > { %212 = sbr.rel (%p3008_p3) target bundleno = 664 (0x298), region = 36 }
  0x43   : > { %2533 = dma.done.wait (%p3009_p5), [#allocation4], 2304  }
  0x44   : > { %2535 = vsyncadd (%p3009_p5), [#allocation4], 4294964992 }
  0x45   : > { %2537 = dma.done.wait (%p3009_p5), [#allocation6], 16  }
  0x46   : > { %2539 = vsyncadd (%p3009_p5), [#allocation6], 4294967280  ;;  %p252_p9 = scmp.lt.s32.totalorder %s2546_s16, 1  ;;  %s1877_s27 = sshll.u32 %s2542_s15, 4  ;;  %v2382_v0 = vld [vmem:[#allocation3] sm:$0xff]   ;;  %v2383_v1 = vld [vmem:[#allocation3 + $0x8] sm:$0xff]  }
  0x47   : > { %p258_p7 = scmp.lt.s32.totalorder %s1877_s27, 31  ;;  %2182 = vmatprep.subr.bf16.mxu0 %v2382_v0  ;;  %vm303_vm0 = vcmask 261120   ;;  %v2384_v10 = vld [vmem:[#allocation3 + $0x10] sm:$0xff]   ;;  %v2385_v12 = vld [vmem:[#allocation3 + $0x18] sm:$0xff]   ;;  %v2386_v16 = vld [vmem:[#allocation3 + $0x20] sm:$0xff]   ;;  %vm1400_vm1 = vcmask 523264  }
  0x48   : > { %s3021_s16 = smov (!%p252_p9, %s2546_s16), 1  ;;  %2183 = vmatpush3.bf16.msra.mxu0 %v2382_v0  ;;  %2314 = vmatprep.subr.bf16.mxu1 %v2384_v10  ;;  %v2388_v14 = vld [vmem:[#allocation3 + $0x30] sm:$0xff]   ;;  %v2390_v18 = vld [vmem:[#allocation3 + $0x38] sm:$0xff]   ;;  %v2387_v21 = vld [vmem:[#allocation3 + $0x28] sm:$0xff]  }
  0x49   : > { %s3023_s27 = smov (!%p258_p7, %s1877_s27), 31  ;;  %s1987_s23 = sshll.u32 %s3021_s16, 6  ;;  %2184 = vmatprep.subr.bf16.mxu0 %v2383_v1  ;;  %2316 = vmatpush3.bf16.msra.mxu1 %v2384_v10  ;;  %v2392_v19 = vld [vmem:[#allocation3 + $0x50] sm:$0xff]   ;;  %v2394_v20 = vld [vmem:[#allocation3 + $0x58] sm:$0xff]   ;;  %v2389_v23 = vld [vmem:[#allocation3 + $0x40] sm:$0xff]  }
  0x4a   : > { %s1880_s11 = sshll.u32 %s3021_s16, 5  ;;  %s256_s14 = scalar_lea.vmem %s2997_s0, %s1987_s23  ;;  %2315 = vmatprep.subr.bf16.mxu1 %v2385_v12  ;;  %v2396_v22 = vld [vmem:[#allocation3 + $0x70] sm:$0xff]   ;;  %v2391_v24 = vld [vmem:[#allocation3 + $0x48] sm:$0xff]   ;;  %v2393_v25 = vld [vmem:[#allocation3 + $0x60] sm:$0xff]  }
  0x4b   : > { %s2701_s20 = sadd.s32 %s1880_s11, %s3023_s27  ;;  %v275_v2 = vld [vmem:[%s256_s14] sm:$0xff]  ;;  %v276_v3 = vld [vmem:[%s256_s14 + $0x8] sm:$0xff]  ;;  %v277_v4 = vld [vmem:[%s256_s14 + $0x10] sm:$0xff]  ;;  %s2318_s15 = smul.u32 20, %s3023_s27 }
  0x4c   : > { %v2703_v5 = vpack.c.bf16 %v276_v3, %v275_v2  ;;  %v278_v6 = vld [vmem:[%s256_s14 + $0x18] sm:$0xff]  ;;  %v279_v7 = vld [vmem:[%s256_s14 + $0x20] sm:$0xff]  ;;  %v280_v8 = vld [vmem:[%s256_s14 + $0x28] sm:$0xff]  ;;  %2185 = vmatpush3.bf16.msra.mxu0 %v2383_v1  ;;  %s1881_s28 = sshll.u32 %s2701_s20, 3 }
  0x4d   : > { %v2705_v9 = vpack.c.bf16 %v280_v8, %v279_v7  ;;  %v2709_v11 = vpack.c.bf16 %v278_v6, %v277_v4  ;;  %v281_v13 = vld [vmem:[%s256_s14 + $0x30] sm:$0xff]  ;;  %2194 = vmatprep.subr.bf16.mxu0 %v2384_v10  ;;  %v282_v15 = vld [vmem:[%s256_s14 + $0x38] sm:$0xff]  ;;  %2317 = vmatpush3.bf16.msra.mxu1 %v2385_v12  ;;  %s2729_s25 = scalar_lea.vmem %s2999_s2, %s2318_s15  ;;  %v2395_v27 = vld [vmem:[#allocation3 + $0x68] sm:$0xff]   ;;  %s2947_s5 = scalar_lea.vmem %s3001_s4, %s1881_s28 }
  0x4e   : > { %2186 = vmatprep.mubr.msk.bf16.mxu0 %vm303_vm0, %v2703_v5  ;;  %v2717_v17 = vpack.c.bf16 %v282_v15, %v281_v13  ;;  %2218 = vmatprep.subr.bf16.mxu1 %v2388_v14  ;;  %v2398_v26 = vld [vmem:[#allocation3 + $0x78] sm:$0xff]   ;;  %v2397_v28 = vld [vmem:[#allocation3 + $0x80] sm:$0xff]   ;;  %v2399_v29 = vld [vmem:[#allocation3 + $0x88] sm:$0xff]  }
  0x4f   : > { %2202 = vmatprep.mubr.msk.bf16.mxu1 %vm303_vm0, %v2705_v9  ;;  %2187 = vmatmul.mubr.msk.bf16.vlgmr.msra.gmra.mrb[0].mxu0 %vm303_vm0, %v2709_v11  ;;  %v2402_v30 = vld [vmem:[%s2729_s25 + $0x4] ss:$20 sps:$4 sm:$0xff]   ;;  %v2416_v31 = vld [vmem:[%s2729_s25 + $0xc] ss:$20 sps:$4 sm:$0xff]  }
  0x50   : > { %2190 = vmatprep.mubr.msk.bf16.mxu0 %vm303_vm0, %v2705_v9  ;;  %2195 = vmatpush3.bf16.msra.mxu0 %v2384_v10 }
  0x51   : > { %2196 = vmatprep.subr.bf16.mxu0 %v2385_v12  ;;  %2203 = vmatmul.mubr.msk.bf16.vlgmr.msra.gmra.mrb[0].mxu1 %vm303_vm0, %v2717_v17 }
  0x52   : > { %2219 = vmatpush3.bf16.msra.mxu1 %v2388_v14  ;;  %2222 = vmatprep.mubr.msk.bf16.mxu1 %vm303_vm0, %v2703_v5 }
  0x53   : > { %2220 = vmatprep.subr.bf16.mxu1 %v2390_v18 }
  0x54   : > { %2197 = vmatpush3.bf16.msra.mxu0 %v2385_v12 }
  0x55   : > { %2206 = vmatprep.subr.bf16.mxu0 %v2386_v16 }
  0x56   : > { %2221 = vmatpush3.bf16.msra.mxu1 %v2390_v18 }
  0x57   : > { %2191 = vmatmul.mubr.msk.bf16.gmra.mrb[4].mxu0 %vm303_vm0, %v2717_v17  ;;  %2242 = vmatprep.subr.bf16.mxu1 %v2392_v19 }
  0x58   : > { %2198 = vmatprep.mubr.msk.bf16.mxu0 %vm303_vm0, %v2703_v5 }
  0x59   : > { %2223 = vmatmul.mubr.msk.bf16.vlgmr.msra.gmra.mrb[4].mxu1 %vm303_vm0, %v2709_v11 }
  0x5a   : > { %2226 = vmatprep.mubr.msk.bf16.mxu1 %vm303_vm0, %v2705_v9  ;;  %2243 = vmatpush3.bf16.msra.mxu1 %v2392_v19 }
  0x5b   : > { %2244 = vmatprep.subr.bf16.mxu1 %v2394_v20 }
  0x5e   : > { %2245 = vmatpush3.bf16.msra.mxu1 %v2394_v20 }
  0x5f   : > { %2199 = vmatmul.mubr.msk.bf16.vlgmr.msra.gmra.mrb[8].mxu0 %vm303_vm0, %v2709_v11  ;;  %2266 = vmatprep.subr.bf16.mxu1 %v2396_v22 }
  0x60   : > { %2207 = vmatpush3.bf16.msra.mxu0 %v2386_v16  ;;  %2210 = vmatprep.mubr.msk.bf16.mxu0 %vm303_vm0, %v2703_v5 }
  0x61   : > { %2208 = vmatprep.subr.bf16.mxu0 %v2387_v21  ;;  %2227 = vmatmul.mubr.msk.bf16.gmra.mrb[8].mxu1 %vm303_vm0, %v2717_v17 }
  0x62   : > { %2246 = vmatprep.mubr.msk.bf16.mxu1 %vm303_vm0, %v2703_v5 }
  0x64   : > { %2209 = vmatpush3.bf16.msra.mxu0 %v2387_v21 }
  0x65   : > { %2230 = vmatprep.subr.bf16.mxu0 %v2389_v23 }
  0x67   : > { %2211 = vmatmul.mubr.msk.bf16.vlgmr.msra.gmra.mrb[12].mxu0 %vm303_vm0, %v2709_v11 }
  0x68   : > { %2214 = vmatprep.mubr.msk.bf16.mxu0 %vm303_vm0, %v2705_v9  ;;  %2231 = vmatpush3.bf16.msra.mxu0 %v2389_v23 }
  0x69   : > { %2232 = vmatprep.subr.bf16.mxu0 %v2391_v24  ;;  %2247 = vmatmul.mubr.msk.bf16.vlgmr.msra.gmra.mrb[12].mxu1 %vm303_vm0, %v2709_v11 }
  0x6a   : > { %2250 = vmatprep.mubr.msk.bf16.mxu1 %vm303_vm0, %v2705_v9  ;;  %2267 = vmatpush3.bf16.msra.mxu1 %v2396_v22 }
  0x6b   : > { %2268 = vmatprep.subr.bf16.mxu1 %v2398_v26 }
  0x6c   : > { %2233 = vmatpush3.bf16.msra.mxu0 %v2391_v24 }
  0x6d   : > { %2254 = vmatprep.subr.bf16.mxu0 %v2393_v25 }
  0x6e   : > { %2269 = vmatpush3.bf16.msra.mxu1 %v2398_v26 }
  0x6f   : > { %2215 = vmatmul.mubr.msk.bf16.gmra.mrb[16].mxu0 %vm303_vm0, %v2717_v17 }
  0x70   : > { %2234 = vmatprep.mubr.msk.bf16.mxu0 %vm303_vm0, %v2703_v5 }
  0x71   : > { %2251 = vmatmul.mubr.msk.bf16.gmra.mrb[16].mxu1 %vm303_vm0, %v2717_v17 }
  0x72   : > { %2270 = vmatprep.mubr.msk.bf16.mxu1 %vm303_vm0, %v2703_v5 }
  0x77   : > { %2235 = vmatmul.mubr.msk.bf16.vlgmr.msra.gmra.mrb[20].mxu0 %vm303_vm0, %v2709_v11 }
  0x78   : > { %2238 = vmatprep.mubr.msk.bf16.mxu0 %vm303_vm0, %v2705_v9  ;;  %2255 = vmatpush3.bf16.msra.mxu0 %v2393_v25 }
  0x79   : > { %2256 = vmatprep.subr.bf16.mxu0 %v2395_v27  ;;  %2271 = vmatmul.mubr.msk.bf16.vlgmr.msra.gmra.mrb[20].mxu1 %vm303_vm0, %v2709_v11 }
  0x7a   : > { %2274 = vmatprep.mubr.msk.bf16.mxu1 %vm303_vm0, %v2705_v9 }
  0x7c   : > { %2257 = vmatpush3.bf16.msra.mxu0 %v2395_v27 }
  0x7d   : > { %2278 = vmatprep.subr.bf16.mxu0 %v2397_v28 }
  0x7f   : > { %2239 = vmatmul.mubr.msk.bf16.gmra.mrb[24].mxu0 %vm303_vm0, %v2717_v17 }
  0x80   : > { %2258 = vmatprep.mubr.msk.bf16.mxu0 %vm303_vm0, %v2703_v5 }
  0x81   : > { %2275 = vmatmul.mubr.msk.bf16.gmra.mrb[24].mxu1 %vm303_vm0, %v2717_v17 }
  0x82   : > { %1457 = vmatprep.mubr.bf16.mxu1 %v2402_v30 }
  0x87   : > { %2259 = vmatmul.mubr.msk.bf16.vlgmr.msra.gmra.mrb[28].mxu0 %vm303_vm0, %v2709_v11 }
  0x88   : > { %2262 = vmatprep.mubr.msk.bf16.mxu0 %vm303_vm0, %v2705_v9  ;;  %2279 = vmatpush3.bf16.msra.mxu0 %v2397_v28 }
  0x89   : > { %2280 = vmatprep.subr.bf16.mxu0 %v2399_v29 }
  0x8c   : > { %2281 = vmatpush3.bf16.msra.mxu0 %v2399_v29 }
  0x8f   : > { %2263 = vmatmul.mubr.msk.bf16.gmra.mrb[32].mxu0 %vm303_vm0, %v2717_v17 }
  0x90   : > { %2282 = vmatprep.mubr.msk.bf16.mxu0 %vm303_vm0, %v2703_v5 }
  0x97   : > { %2283 = vmatmul.mubr.msk.bf16.vlgmr.msra.gmra.mrb[36].mxu0 %vm303_vm0, %v2709_v11 }
  0x98   : > { %2286 = vmatprep.mubr.msk.bf16.mxu0 %vm303_vm0, %v2705_v9 }
  0x9f   : > { %2287 = vmatmul.mubr.msk.bf16.gmra.mrb[40].mxu0 %vm303_vm0, %v2717_v17 }
  0xa0   : > { %1554 = vmatprep.mubr.bf16.mxu0 %v2416_v31 }
 0x122   : > { %v2188_v32 = vpop.f32.mrb[0].mxu0 }
 0x123   : > { %v350_v33 = vpop.f32.mrb[1].mxu0 }
 0x124   : > { %v2189_v34 = vpop.f32.mrb[2].mxu0  ;;  %v2791_v38 = vpop.f32.mrb[0].mxu1 }
 0x125   : > { %v382_v35 = vpack.c.bf16 %v2189_v34, %v2188_v32  ;;  %v353_v36 = vpop.f32.mrb[3].mxu0  ;;  %v2793_v39 = vpop.f32.mrb[1].mxu1 }
 0x126   : > { %v381_v37 = vpack.c.bf16 %v353_v36, %v350_v33  ;;  %v2795_v40 = vpop.f32.mrb[2].mxu1 }
 0x127   : > { %v474_v42 = vpack.c.bf16 %v2795_v40, %v2791_v38  ;;  %v2801_v43 = vpop.f32.mrb[3].mxu1 }
 0x128   : > { %v473_v45 = vpack.c.bf16 %v2801_v43, %v2793_v39  ;;  %v2403_v39 = vld [vmem:[%s2729_s25 + $0x2c] ss:$20 sps:$4 sm:$0xff]  }
 0x12a   : > { %v2797_v41 = vpop.f32.mrb[4].mxu0 }
 0x12b   : > { %v366_v44 = vpop.f32.mrb[5].mxu0 }
 0x12c   : > { %v2193_v46 = vpop.f32.mrb[6].mxu0  ;;  %v2224_v50 = vpop.f32.mrb[4].mxu1 }
 0x12d   : > { %v384_v47 = vpack.c.bf16 %v2193_v46, %v2797_v41  ;;  %v369_v48 = vpop.f32.mrb[7].mxu0  ;;  %v620_v51 = vpop.f32.mrb[5].mxu1 }
 0x12e   : > { %v383_v49 = vpack.c.bf16 %v369_v48, %v366_v44  ;;  %v2225_v52 = vpop.f32.mrb[6].mxu1 }
 0x12f   : > { %v652_v54 = vpack.c.bf16 %v2225_v52, %v2224_v50  ;;  %v623_v55 = vpop.f32.mrb[7].mxu1 }
 0x130   : > { %v651_v57 = vpack.c.bf16 %v623_v55, %v620_v51 }
 0x132   : > { %v2806_v53 = vpop.f32.mrb[8].mxu0 }
 0x133   : > { %v440_v56 = vpop.f32.mrb[9].mxu0 }
 0x134   : > { %v2201_v58 = vpop.f32.mrb[10].mxu0  ;;  %v2809_v62 = vpop.f32.mrb[8].mxu1 }
 0x135   : > { %v472_v59 = vpack.c.bf16 %v2201_v58, %v2806_v53  ;;  %v443_v60 = vpop.f32.mrb[11].mxu0  ;;  %v636_v63 = vpop.f32.mrb[9].mxu1 }
 0x136   : > { %v471_v61 = vpack.c.bf16 %v443_v60, %v440_v56  ;;  %v2811_v0 = vpop.f32.mrb[10].mxu1 }
 0x137   : > { %v654_v2 = vpack.c.bf16 %v2811_v0, %v2809_v62  ;;  %v639_v3 = vpop.f32.mrb[11].mxu1 }
 0x138   : > { %v653_v5 = vpack.c.bf16 %v639_v3, %v636_v63 }
 0x13a   : > { %v2212_v1 = vpop.f32.mrb[12].mxu0 }
 0x13b   : > { %v530_v4 = vpop.f32.mrb[13].mxu0 }
 0x13c   : > { %v2213_v6 = vpop.f32.mrb[14].mxu0  ;;  %v2815_v10 = vpop.f32.mrb[12].mxu1 }
 0x13d   : > { %v562_v7 = vpack.c.bf16 %v2213_v6, %v2212_v1  ;;  %v533_v8 = vpop.f32.mrb[15].mxu0  ;;  %v2817_v11 = vpop.f32.mrb[13].mxu1 }
 0x13e   : > { %v561_v9 = vpack.c.bf16 %v533_v8, %v530_v4  ;;  %v2819_v12 = vpop.f32.mrb[14].mxu1 }
 0x13f   : > { %v832_v14 = vpack.c.bf16 %v2819_v12, %v2815_v10  ;;  %v2823_v15 = vpop.f32.mrb[15].mxu1  ;;  %v2414_v10 = vld [vmem:[%s2729_s25 + $0x8] ss:$20 sps:$4 sm:$0xff]   ;;  %v2417_v12 = vld [vmem:[%s2729_s25 + $0xa0] ss:$20 sps:$4 sm:$0xff]  }
 0x140   : > { %2042 = vmatprep.subr.bf16.mxu1 %v561_v9  ;;  %v831_v17 = vpack.c.bf16 %v2823_v15, %v2817_v11 }
 0x141   : > { %2043 = vmatpush3.bf16.msra.mxu1 %v381_v37 }
 0x142   : > { %v2216_v13 = vpop.f32.mrb[16].mxu0  ;;  %2044 = vmatprep.subr.bf16.mxu1 %v562_v7  ;;  %v2408_v7 = vld [vmem:[%s2729_s25 + $0x50] ss:$20 sps:$4 sm:$0xff]  }
 0x143   : > { %v546_v16 = vpop.f32.mrb[17].mxu0 }
 0x144   : > { %v2217_v18 = vpop.f32.mrb[18].mxu0  ;;  %v2827_v22 = vpop.f32.mrb[16].mxu1 }
 0x145   : > { %v564_v19 = vpack.c.bf16 %v2217_v18, %v2216_v13  ;;  %v549_v20 = vpop.f32.mrb[19].mxu0  ;;  %2045 = vmatpush3.bf16.msra.mxu1 %v382_v35  ;;  %v2829_v23 = vpop.f32.mrb[17].mxu1 }
 0x146   : > { %v563_v21 = vpack.c.bf16 %v549_v20, %v546_v16  ;;  %v2831_v24 = vpop.f32.mrb[18].mxu1  ;;  %v2409_v16 = vld [vmem:[%s2729_s25 + $0x7c] ss:$20 sps:$4 sm:$0xff]   ;;  %v2411_v20 = vld [vmem:[%s2729_s25 + $0x78] ss:$20 sps:$4 sm:$0xff]  }
 0x147   : > { %v834_v26 = vpack.c.bf16 %v2831_v24, %v2827_v22  ;;  %v2835_v27 = vpop.f32.mrb[19].mxu1  ;;  %v2428_v22 = vld [vmem:[%s2729_s25 + $0xf0] ss:$20 sps:$4 sm:$0xff]   ;;  %v2429_v24 = vld [vmem:[%s2729_s25 + $0x58] ss:$20 sps:$4 sm:$0xff]  }
 0x148   : > { %2046 = vmatprep.subr.bf16.mxu1 %v563_v21  ;;  %v833_v29 = vpack.c.bf16 %v2835_v27, %v2829_v23  ;;  %v2422_v23 = vld [vmem:[%s2729_s25 + $0xc8] ss:$20 sps:$4 sm:$0xff]   ;;  %v2423_v27 = vld [vmem:[%s2729_s25 + $0x30] ss:$20 sps:$4 sm:$0xff]  }
 0x149   : > { %2047 = vmatpush3.bf16.msra.mxu1 %v383_v49 }
 0x14a   : > { %v2236_v25 = vpop.f32.mrb[20].mxu0  ;;  %2048 = vmatprep.subr.bf16.mxu1 %v564_v19 }
 0x14b   : > { %v710_v28 = vpop.f32.mrb[21].mxu0 }
 0x14c   : > { %v2237_v30 = vpop.f32.mrb[22].mxu0  ;;  %v2839_v34 = vpop.f32.mrb[20].mxu1 }
 0x14d   : > { %v742_v31 = vpack.c.bf16 %v2237_v30, %v2236_v25  ;;  %v713_v32 = vpop.f32.mrb[23].mxu0  ;;  %2049 = vmatpush3.bf16.msra.mxu1 %v384_v47  ;;  %v980_v35 = vpop.f32.mrb[21].mxu1  ;;  %v2412_v25 = vld [vmem:[%s2729_s25 + $0xa4] ss:$20 sps:$4 sm:$0xff]   ;;  %v2426_v30 = vld [vmem:[%s2729_s25 + $0x5c] ss:$20 sps:$4 sm:$0xff]  }
 0x14e   : > { %v741_v33 = vpack.c.bf16 %v713_v32, %v710_v28  ;;  %2050 = vmatprep.subr.bf16.mxu1 %v651_v57  ;;  %v2841_v36 = vpop.f32.mrb[22].mxu1  ;;  %v2420_v28 = vld [vmem:[%s2729_s25 + $0x34] ss:$20 sps:$4 sm:$0xff]   ;;  %v2434_v32 = vld [vmem:[%s2729_s25 + $0x118] ss:$20 sps:$4 sm:$0xff]  }
 0x14f   : > { %v1012_v41 = vpack.c.bf16 %v2841_v36, %v2839_v34  ;;  %v983_v44 = vpop.f32.mrb[23].mxu1  ;;  %v2436_v34 = vld [vmem:[%s2729_s25 + $0xac] ss:$20 sps:$4 sm:$0xff]   ;;  %v2439_v36 = vld [vmem:[%s2729_s25 + $0xa8] ss:$20 sps:$4 sm:$0xff]  }
 0x150   : > { %v1011_v48 = vpack.c.bf16 %v983_v44, %v980_v35  ;;  %v2438_v35 = vld [vmem:[%s2729_s25 + $0x10] ss:$20 sps:$4 sm:$0xff]   ;;  %v2443_v44 = vld [vmem:[%s2729_s25 + $0x60] ss:$20 sps:$4 sm:$0xff]  }
 0x151   : > { %2051 = vmatpush3.bf16.msra.mxu1 %v471_v61  ;;  %v2400_v61 = vld [vmem:[%s2729_s25] ss:$20 sps:$4 sm:$0xff]  }
 0x152   : > { %v2240_v37 = vpop.f32.mrb[24].mxu0  ;;  %2052 = vmatprep.subr.bf16.mxu1 %v652_v54 }
 0x153   : > { %v726_v46 = vpop.f32.mrb[25].mxu0 }
 0x154   : > { %v2241_v49 = vpop.f32.mrb[26].mxu0  ;;  %v2845_v52 = vpop.f32.mrb[24].mxu1 }
 0x155   : > { %v744_v50 = vpack.c.bf16 %v2241_v49, %v2240_v37  ;;  %v729_v47 = vpop.f32.mrb[27].mxu0  ;;  %2053 = vmatpush3.bf16.msra.mxu1 %v472_v59  ;;  %v996_v53 = vpop.f32.mrb[25].mxu1  ;;  %v2440_v37 = vld [vmem:[%s2729_s25 + $0x38] ss:$20 sps:$4 sm:$0xff]   ;;  %v2446_v49 = vld [vmem:[%s2729_s25 + $0xfc] ss:$20 sps:$4 sm:$0xff]  }
 0x156   : > { %v743_v51 = vpack.c.bf16 %v729_v47, %v726_v46  ;;  %2054 = vmatprep.subr.bf16.mxu1 %v653_v5  ;;  %v2850_v54 = vpop.f32.mrb[26].mxu1  ;;  %v2406_v5 = vld [vmem:[%s2729_s25 + $0x54] ss:$20 sps:$4 sm:$0xff]   ;;  %v2444_v46 = vld [vmem:[%s2729_s25 + $0xd0] ss:$20 sps:$4 sm:$0xff]  }
 0x157   : > { %v1014_v56 = vpack.c.bf16 %v2850_v54, %v2845_v52  ;;  %v999_v57 = vpop.f32.mrb[27].mxu1  ;;  %v2449_v47 = vld [vmem:[%s2729_s25 + $0xf8] ss:$20 sps:$4 sm:$0xff]   ;;  %v2454_v54 = vld [vmem:[%s2729_s25 + $0x120] ss:$20 sps:$4 sm:$0xff]  }
 0x158   : > { %v1013_v59 = vpack.c.bf16 %v999_v57, %v996_v53  ;;  %v2451_v52 = vld [vmem:[%s2729_s25 + $0x124] ss:$20 sps:$4 sm:$0xff]   ;;  %v2453_v53 = vld [vmem:[%s2729_s25 + $0x100] ss:$20 sps:$4 sm:$0xff]  }
 0x159   : > { %2055 = vmatpush3.bf16.msra.mxu1 %v473_v45 }
 0x15a   : > { %v2260_v55 = vpop.f32.mrb[28].mxu0  ;;  %2056 = vmatprep.subr.bf16.mxu1 %v654_v2  ;;  %v2405_v2 = vld [vmem:[%s2729_s25 + $0x28] ss:$20 sps:$4 sm:$0xff]  }
 0x15b   : > { %v890_v58 = vpop.f32.mrb[29].mxu0 }
 0x15c   : > { %v2261_v60 = vpop.f32.mrb[30].mxu0 }
 0x15d   : > { %v922_v62 = vpack.c.bf16 %v2261_v60, %v2260_v55  ;;  %v893_v63 = vpop.f32.mrb[31].mxu0  ;;  %2057 = vmatpush3.bf16.msra.mxu1 %v474_v42  ;;  %v2455_v55 = vld [vmem:[%s2729_s25 + $0x128] ss:$20 sps:$4 sm:$0xff]  }
 0x15e   : > { %v921_v43 = vpack.c.bf16 %v893_v63, %v890_v58 }
 0x160   : > { %1458 = vmatmul.mubr.bf16.vlgmr.msra.gmra.mrb[28].mxu1 %v2400_v61  ;;  %2106 = vmatprep.subr.bf16.mxu0 %v921_v43 }
 0x161   : > { %2107 = vmatpush3.bf16.msra.mxu0 %v741_v33  ;;  %1465 = vmatprep.mubr.bf16.mxu1 %v2403_v39  ;;  %v2435_v33 = vld [vmem:[%s2729_s25 + $0x80] ss:$20 sps:$4 sm:$0xff]  }
 0x162   : > { %v2264_v45 = vpop.f32.mrb[32].mxu0  ;;  %2108 = vmatprep.subr.bf16.mxu0 %v922_v62 }
 0x163   : > { %v906_v0 = vpop.f32.mrb[33].mxu0 }
 0x164   : > { %v2265_v1 = vpop.f32.mrb[34].mxu0 }
 0x165   : > { %v924_v3 = vpack.c.bf16 %v2265_v1, %v2264_v45  ;;  %v909_v4 = vpop.f32.mrb[35].mxu0  ;;  %2109 = vmatpush3.bf16.msra.mxu0 %v742_v31  ;;  %v2432_v31 = vld [vmem:[%s2729_s25 + $0x84] ss:$20 sps:$4 sm:$0xff]  }
 0x166   : > { %v923_v38 = vpack.c.bf16 %v909_v4, %v906_v0 }
 0x168   : > { %1466 = vmatmul.mubr.bf16.gmra.mrb[32].mxu1 %v2405_v2  ;;  %2110 = vmatprep.subr.bf16.mxu0 %v923_v38 }
 0x169   : > { %2111 = vmatpush3.bf16.msra.mxu0 %v743_v51  ;;  %1473 = vmatprep.mubr.bf16.mxu1 %v2406_v5  ;;  %v2450_v51 = vld [vmem:[%s2729_s25 + $0xd8] ss:$20 sps:$4 sm:$0xff]  }
 0x16a   : > { %v2284_v40 = vpop.f32.mrb[36].mxu0  ;;  %2112 = vmatprep.subr.bf16.mxu0 %v924_v3 }
 0x16b   : > { %v1070_v42 = vpop.f32.mrb[37].mxu0 }
 0x16c   : > { %v2285_v6 = vpop.f32.mrb[38].mxu0 }
 0x16d   : > { %v1102_v8 = vpack.c.bf16 %v2285_v6, %v2284_v40  ;;  %v1073_v9 = vpop.f32.mrb[39].mxu0  ;;  %2113 = vmatpush3.bf16.msra.mxu0 %v744_v50  ;;  %v2448_v50 = vld [vmem:[%s2729_s25 + $0xb0] ss:$20 sps:$4 sm:$0xff]  }
 0x16e   : > { %v1101_v13 = vpack.c.bf16 %v1073_v9, %v1070_v42  ;;  %2114 = vmatprep.subr.bf16.mxu0 %v1011_v48  ;;  %v2445_v48 = vld [vmem:[%s2729_s25 + $0x88] ss:$20 sps:$4 sm:$0xff]  }
 0x170   : > { %1474 = vmatmul.mubr.bf16.gmra.mrb[36].mxu1 %v2408_v7  ;;  %2290 = vmatprep.subr.bf16.mxu1 %v1101_v13 }
 0x171   : > { %2115 = vmatpush3.bf16.msra.mxu0 %v831_v17  ;;  %2291 = vmatpush3.bf16.msra.mxu1 %v1101_v13  ;;  %v2915_v13 = vld [vmem:[#allocation5] ss:$0 sm:$0xff] }
 0x172   : > { %2292 = vmatprep.subr.bf16.mxu1 %v1102_v8  ;;  %2116 = vmatprep.subr.bf16.mxu0 %v1012_v41  ;;  %v2288_v18 = vpop.f32.mrb[40].mxu0  ;;  %v2441_v41 = vld [vmem:[%s2729_s25 + $0xd4] ss:$20 sps:$4 sm:$0xff]  }
 0x173   : > { %1481 = vmatprep.mubr.bf16.mxu1 %v2409_v16  ;;  %v1086_v19 = vpop.f32.mrb[41].mxu0 }
 0x174   : > { %v2289_v21 = vpop.f32.mrb[42].mxu0 }
 0x175   : > { %2117 = vmatpush3.bf16.msra.mxu0 %v832_v14  ;;  %2293 = vmatpush3.bf16.msra.mxu1 %v1102_v8  ;;  %v1104_v11 = vpack.c.bf16 %v2289_v21, %v2288_v18  ;;  %v1089_v15 = vpop.f32.mrb[43].mxu0  ;;  %v2418_v14 = vld [vmem:[%s2729_s25 + $0xcc] ss:$20 sps:$4 sm:$0xff]  }
 0x176   : > { %2118 = vmatprep.subr.bf16.mxu0 %v1013_v59  ;;  %v1103_v17 = vpack.c.bf16 %v1089_v15, %v1086_v19 }
 0x178   : > { %1482 = vmatmul.mubr.bf16.gmra.mrb[40].mxu1 %v2411_v20  ;;  %2294 = vmatprep.subr.bf16.mxu1 %v1103_v17 }
 0x179   : > { %2119 = vmatpush3.bf16.msra.mxu0 %v833_v29  ;;  %1489 = vmatprep.mubr.bf16.mxu1 %v2412_v25  ;;  %v2424_v29 = vld [vmem:[%s2729_s25 + $0xf4] ss:$20 sps:$4 sm:$0xff]  }
 0x17a   : > { %2120 = vmatprep.subr.bf16.mxu0 %v1014_v56  ;;  %2295 = vmatpush3.bf16.msra.mxu1 %v1103_v17 }
 0x17b   : > { %2296 = vmatprep.subr.bf16.mxu1 %v1104_v11 }
 0x17d   : > { %2121 = vmatpush3.bf16.msra.mxu0 %v834_v26  ;;  %v2430_v26 = vld [vmem:[%s2729_s25 + $0x11c] ss:$20 sps:$4 sm:$0xff]  }
 0x17e   : > { %2297 = vmatpush3.bf16.msra.mxu1 %v1104_v11 }
 0x180   : > { %1490 = vmatmul.mubr.bf16.gmra.mrb[44].mxu1 %v2417_v12  ;;  %1555 = vmatmul.mubr.bf16.vlgmr.msra.gmra.mrb[44].mxu0 %v2414_v10 }
 0x181   : > { %1497 = vmatprep.mubr.bf16.mxu1 %v2418_v14  ;;  %1562 = vmatprep.mubr.bf16.mxu0 %v2420_v28 }
 0x188   : > { %1498 = vmatmul.mubr.bf16.gmra.mrb[48].mxu1 %v2422_v23  ;;  %1563 = vmatmul.mubr.bf16.gmra.mrb[48].mxu0 %v2423_v27 }
 0x189   : > { %1505 = vmatprep.mubr.bf16.mxu1 %v2424_v29  ;;  %1570 = vmatprep.mubr.bf16.mxu0 %v2426_v30 }
 0x190   : > { %1506 = vmatmul.mubr.bf16.gmra.mrb[52].mxu1 %v2428_v22  ;;  %1571 = vmatmul.mubr.bf16.gmra.mrb[52].mxu0 %v2429_v24 }
 0x191   : > { %1513 = vmatprep.mubr.bf16.mxu1 %v2430_v26  ;;  %1578 = vmatprep.mubr.bf16.mxu0 %v2432_v31 }
 0x198   : > { %1514 = vmatmul.mubr.bf16.gmra.mrb[56].mxu1 %v2434_v32  ;;  %1579 = vmatmul.mubr.bf16.gmra.mrb[56].mxu0 %v2435_v33 }
 0x199   : > { %1586 = vmatprep.mubr.bf16.mxu0 %v2436_v34  ;;  %2298 = vmatprep.mubr.msk.bf16.mxu1 %vm1400_vm1, %v2438_v35 }
 0x1a0   : > { %1587 = vmatmul.mubr.bf16.gmra.mrb[60].mxu0 %v2439_v36  ;;  %2299 = vmatmul.mubr.msk.bf16.vlgmr.msra.gmra.mrb[60].mxu1 %vm1400_vm1, %v2440_v37 }
 0x1a1   : > { %1594 = vmatprep.mubr.bf16.mxu0 %v2441_v41  ;;  %2302 = vmatprep.mubr.msk.bf16.mxu1 %vm1400_vm1, %v2443_v44 }
 0x1a8   : > { %1595 = vmatmul.mubr.bf16.gmra.mrb[64].mxu0 %v2444_v46  ;;  %2303 = vmatmul.mubr.msk.bf16.gmra.mrb[64].mxu1 %vm1400_vm1, %v2445_v48 }
 0x1a9   : > { %1602 = vmatprep.mubr.bf16.mxu0 %v2446_v49  ;;  %2306 = vmatprep.mubr.msk.bf16.mxu1 %vm1400_vm1, %v2448_v50 }
 0x1b0   : > { %1603 = vmatmul.mubr.bf16.gmra.mrb[68].mxu0 %v2449_v47  ;;  %2307 = vmatmul.mubr.msk.bf16.gmra.mrb[68].mxu1 %vm1400_vm1, %v2450_v51 }
 0x1b1   : > { %1610 = vmatprep.mubr.bf16.mxu0 %v2451_v52  ;;  %2310 = vmatprep.mubr.msk.bf16.mxu1 %vm1400_vm1, %v2453_v53 }
 0x1b8   : > { %1611 = vmatmul.mubr.bf16.gmra.mrb[72].mxu0 %v2454_v54  ;;  %2311 = vmatmul.mubr.msk.bf16.gmra.mrb[72].mxu1 %vm1400_vm1, %v2455_v55 }
 0x233   : > { %v2058_v56 = vpop.f32.mrb[28].mxu1 }
 0x234   : > { %v2059_v57 = vpop.f32.mrb[29].mxu1 }
 0x235   : > { %v2060_v58 = vadd.f32 %v2059_v57, %v2058_v56  ;;  %v2061_v59 = vpop.f32.mrb[30].mxu1 }
 0x236   : > { %v2062_v60 = vpop.f32.mrb[31].mxu1 }
 0x237   : > { %v2063_v61 = vadd.f32 %v2062_v60, %v2061_v59  ;;  %v1460_v21 = vadd.f32 %v2060_v58, %v2915_v13 }
 0x239   : > { %v1463_v14 = vadd.f32 %v2063_v61, %v2915_v13 }
 0x23b   : > { %v2064_v62 = vpop.f32.mrb[32].mxu1 }
 0x23c   : > { %v2065_v63 = vpop.f32.mrb[33].mxu1 }
 0x23d   : > { %v2066_v39 = vadd.f32 %v2065_v63, %v2064_v62  ;;  %v2067_v43 = vpop.f32.mrb[34].mxu1 }
 0x23e   : > { %v2068_v45 = vpop.f32.mrb[35].mxu1 }
 0x23f   : > { %v2069_v0 = vadd.f32 %v2068_v45, %v2067_v43  ;;  %v1468_v31 = vadd.f32 %v2066_v39, %v2915_v13 }
 0x241   : > { %v1471_v41 = vadd.f32 %v2069_v0, %v2915_v13 }
 0x243   : > { %v2070_v1 = vpop.f32.mrb[36].mxu1 }
 0x244   : > { %v2071_v2 = vpop.f32.mrb[37].mxu1 }
 0x245   : > { %v2072_v3 = vadd.f32 %v2071_v2, %v2070_v1  ;;  %v2073_v4 = vpop.f32.mrb[38].mxu1 }
 0x246   : > { %v2074_v5 = vpop.f32.mrb[39].mxu1 }
 0x247   : > { %v2075_v38 = vadd.f32 %v2074_v5, %v2073_v4  ;;  %v1476_v53 = vadd.f32 %v2072_v3, %v2915_v13 }
 0x249   : > { %v1479_v60 = vadd.f32 %v2075_v38, %v2915_v13 }
 0x24b   : > { %v2076_v40 = vpop.f32.mrb[40].mxu1 }
 0x24c   : > { %v2077_v42 = vpop.f32.mrb[41].mxu1 }
 0x24d   : > { %v2078_v6 = vadd.f32 %v2077_v42, %v2076_v40  ;;  %v2079_v7 = vpop.f32.mrb[42].mxu1 }
 0x24e   : > { %v2080_v8 = vpop.f32.mrb[43].mxu1 }
 0x24f   : > { %v2081_v9 = vadd.f32 %v2080_v8, %v2079_v7  ;;  %v1484_v2 = vadd.f32 %v2078_v6, %v2915_v13 }
 0x251   : > { %v1487_v38 = vadd.f32 %v2081_v9, %v2915_v13 }
 0x253   : > { %v2122_v16 = vpop.f32.mrb[44].mxu0  ;;  %v2082_v18 = vpop.f32.mrb[44].mxu1 }
 0x254   : > { %v2123_v19 = vpop.f32.mrb[45].mxu0  ;;  %v2083_v20 = vpop.f32.mrb[45].mxu1 }
 0x255   : > { %v2124_v25 = vadd.f32 %v2123_v19, %v2122_v16  ;;  %v2125_v11 = vpop.f32.mrb[46].mxu0  ;;  %v2918_v15 = vadd.f32 %v2083_v20, %v2082_v18  ;;  %v2085_v17 = vpop.f32.mrb[46].mxu1 }
 0x256   : > { %v2126_v10 = vpop.f32.mrb[47].mxu0  ;;  %v2086_v12 = vpop.f32.mrb[47].mxu1 }
 0x257   : > { %v2127_v28 = vadd.f32 %v2126_v10, %v2125_v11  ;;  %v2921_v23 = vadd.f32 %v2086_v12, %v2085_v17  ;;  %v1557_v27 = vadd.f32 %v2124_v25, %v1460_v21  ;;  %v1492_v9 = vadd.f32 %v2918_v15, %v2915_v13 }
 0x259   : > { %v2923_v29 = vadd.f32 %v2127_v28, %v1463_v14  ;;  %v1495_v28 = vadd.f32 %v2921_v23, %v2915_v13 }
 0x25b   : > { %v2128_v30 = vpop.f32.mrb[48].mxu0  ;;  %v2088_v22 = vpop.f32.mrb[48].mxu1 }
 0x25c   : > { %v2129_v24 = vpop.f32.mrb[49].mxu0  ;;  %v2089_v26 = vpop.f32.mrb[49].mxu1 }
 0x25d   : > { %v2130_v32 = vadd.f32 %v2129_v24, %v2128_v30  ;;  %v2131_v33 = vpop.f32.mrb[50].mxu0  ;;  %v2926_v34 = vadd.f32 %v2089_v26, %v2088_v22  ;;  %v2091_v35 = vpop.f32.mrb[50].mxu1 }
 0x25e   : > { %v2132_v36 = vpop.f32.mrb[51].mxu0  ;;  %v2092_v37 = vpop.f32.mrb[51].mxu1 }
 0x25f   : > { %v2133_v44 = vadd.f32 %v2132_v36, %v2131_v33  ;;  %v2929_v46 = vadd.f32 %v2092_v37, %v2091_v35  ;;  %v1565_v48 = vadd.f32 %v2130_v32, %v1468_v31 }
 0x261   : > { %v1568_v49 = vadd.f32 %v2133_v44, %v1471_v41 }
 0x263   : > { %v2134_v50 = vpop.f32.mrb[52].mxu0  ;;  %v2094_v47 = vpop.f32.mrb[52].mxu1 }
 0x264   : > { %v2135_v51 = vpop.f32.mrb[53].mxu0  ;;  %v2095_v52 = vpop.f32.mrb[53].mxu1 }
 0x265   : > { %v2136_v54 = vadd.f32 %v2135_v51, %v2134_v50  ;;  %v2137_v55 = vpop.f32.mrb[54].mxu0  ;;  %v2932_v56 = vadd.f32 %v2095_v52, %v2094_v47  ;;  %v2097_v57 = vpop.f32.mrb[54].mxu1  ;;  %v1503_v52 = vadd.f32 %v2929_v46, %v2915_v13 }
 0x266   : > { %v2138_v58 = vpop.f32.mrb[55].mxu0  ;;  %v2098_v59 = vpop.f32.mrb[55].mxu1 }
 0x267   : > { %v2139_v61 = vadd.f32 %v2138_v58, %v2137_v55  ;;  %v2935_v62 = vadd.f32 %v2098_v59, %v2097_v57  ;;  %v1573_v63 = vadd.f32 %v2136_v54, %v1476_v53 }
 0x269   : > { %v1576_v39 = vadd.f32 %v2139_v61, %v1479_v60 }
 0x26b   : > { %v2140_v43 = vpop.f32.mrb[56].mxu0  ;;  %v2100_v45 = vpop.f32.mrb[56].mxu1 }
 0x26c   : > { %v2141_v0 = vpop.f32.mrb[57].mxu0  ;;  %v2101_v1 = vpop.f32.mrb[57].mxu1 }
 0x26d   : > { %v2142_v3 = vadd.f32 %v2141_v0, %v2140_v43  ;;  %v2143_v4 = vpop.f32.mrb[58].mxu0  ;;  %v2938_v5 = vadd.f32 %v2101_v1, %v2100_v45  ;;  %v2103_v40 = vpop.f32.mrb[58].mxu1 }
 0x26e   : > { %v2144_v42 = vpop.f32.mrb[59].mxu0  ;;  %v2104_v7 = vpop.f32.mrb[59].mxu1 }
 0x26f   : > { %v2145_v8 = vadd.f32 %v2144_v42, %v2143_v4  ;;  %v2941_v16 = vadd.f32 %v2104_v7, %v2103_v40  ;;  %v1581_v18 = vadd.f32 %v2142_v3, %v1484_v2  ;;  %v1508_v3 = vadd.f32 %v2932_v56, %v2915_v13 }
 0x270   : > { %v1511_v7 = vadd.f32 %v2935_v62, %v2915_v13 }
 0x271   : > { %v1584_v19 = vadd.f32 %v2145_v8, %v1487_v38 }
 0x273   : > { %v2146_v20 = vpop.f32.mrb[60].mxu0  ;;  %v2300_v21 = vpop.f32.mrb[60].mxu1 }
 0x274   : > { %v1662_v25 = vadd.f32 %v2300_v21, %v1565_v48  ;;  %v2147_v11 = vpop.f32.mrb[61].mxu0  ;;  %v1653_v6 = vpop.f32.mrb[61].mxu1 }
 0x275   : > { %v2148_v17 = vadd.f32 %v2147_v11, %v2146_v20  ;;  %v1654_v10 = vadd.f32 %v1653_v6, %v1557_v27  ;;  %v2149_v12 = vpop.f32.mrb[62].mxu0  ;;  %v2301_v14 = vpop.f32.mrb[62].mxu1 }
 0x276   : > { %v1718_v30 = vmax.f32 %v1662_v25, 0.0  ;;  %v1665_v22 = vadd.f32 %v2301_v14, %v1568_v49  ;;  %v2150_v24 = vpop.f32.mrb[63].mxu0  ;;  %v1656_v26 = vpop.f32.mrb[63].mxu1  ;;  %v1500_v49 = vadd.f32 %v2926_v34, %v2915_v13  ;;  %v1516_v14 = vadd.f32 %v2938_v5, %v2915_v13 }
 0x277   : > { %v1716_v31 = vmax.f32 %v1654_v10, 0.0  ;;  %v2151_v32 = vadd.f32 %v2150_v24, %v2149_v12  ;;  %v1657_v33 = vadd.f32 %v1656_v26, %v2923_v29  ;;  %v1589_v35 = vadd.f32 %v2148_v17, %v1492_v9 }
 0x278   : > { %1734 = vst [vmem:[%s2947_s5 + $0x10] sm:$0xff] %v1718_v30  ;;  %v1719_v15 = vmax.f32 %v1665_v22, 0.0  ;;  %v1519_v26 = vadd.f32 %v2941_v16, %v2915_v13 }
 0x279   : > { %1732 = vst [vmem:[%s2947_s5] sm:$0xff] %v1716_v31  ;;  %v1717_v27 = vmax.f32 %v1657_v33, 0.0  ;;  %v1592_v36 = vadd.f32 %v2151_v32, %v1495_v28 }
 0x27a   : > { %1735 = vst [vmem:[%s2947_s5 + $0x18] sm:$0xff] %v1719_v15 }
 0x27b   : > { %1733 = vst [vmem:[%s2947_s5 + $0x8] sm:$0xff] %v1717_v27  ;;  %v2152_v37 = vpop.f32.mrb[64].mxu0  ;;  %v2304_v41 = vpop.f32.mrb[64].mxu1 }
 0x27c   : > { %v1678_v44 = vadd.f32 %v2304_v41, %v1581_v18  ;;  %v2153_v23 = vpop.f32.mrb[65].mxu0  ;;  %v1669_v48 = vpop.f32.mrb[65].mxu1 }
 0x27d   : > { %v2154_v50 = vadd.f32 %v2153_v23, %v2152_v37  ;;  %v1670_v29 = vadd.f32 %v1669_v48, %v1573_v63  ;;  %v2155_v47 = vpop.f32.mrb[66].mxu0  ;;  %v2305_v51 = vpop.f32.mrb[66].mxu1 }
 0x27e   : > { %v1722_v53 = vmax.f32 %v1678_v44, 0.0  ;;  %v1681_v54 = vadd.f32 %v2305_v51, %v1584_v19  ;;  %v2156_v55 = vpop.f32.mrb[67].mxu0  ;;  %v1672_v57 = vpop.f32.mrb[67].mxu1 }
 0x27f   : > { %v1720_v58 = vmax.f32 %v1670_v29, 0.0  ;;  %v2157_v59 = vadd.f32 %v2156_v55, %v2155_v47  ;;  %v1673_v60 = vadd.f32 %v1672_v57, %v1576_v39  ;;  %v1597_v61 = vadd.f32 %v2154_v50, %v1500_v49 }
 0x280   : > { %1738 = vst [vmem:[%s2947_s5 + $0x30] sm:$0xff] %v1722_v53  ;;  %v1723_v34 = vmax.f32 %v1681_v54, 0.0 }
 0x281   : > { %1736 = vst [vmem:[%s2947_s5 + $0x20] sm:$0xff] %v1720_v58  ;;  %v1721_v43 = vmax.f32 %v1673_v60, 0.0  ;;  %v1600_v63 = vadd.f32 %v2157_v59, %v1503_v52 }
 0x282   : > { %1739 = vst [vmem:[%s2947_s5 + $0x38] sm:$0xff] %v1723_v34 }
 0x283   : > { %1737 = vst [vmem:[%s2947_s5 + $0x28] sm:$0xff] %v1721_v43  ;;  %v2158_v45 = vpop.f32.mrb[68].mxu0  ;;  %v2308_v0 = vpop.f32.mrb[68].mxu1 }
 0x284   : > { %v1694_v1 = vadd.f32 %v2308_v0, %v1597_v61  ;;  %v2159_v2 = vpop.f32.mrb[69].mxu0  ;;  %v1685_v46 = vpop.f32.mrb[69].mxu1 }
 0x285   : > { %v2160_v4 = vadd.f32 %v2159_v2, %v2158_v45  ;;  %v1686_v39 = vadd.f32 %v1685_v46, %v1589_v35  ;;  %v2161_v40 = vpop.f32.mrb[70].mxu0  ;;  %v2309_v42 = vpop.f32.mrb[70].mxu1 }
 0x286   : > { %v1726_v38 = vmax.f32 %v1694_v1, 0.0  ;;  %v1697_v8 = vadd.f32 %v2309_v42, %v1600_v63  ;;  %v2162_v18 = vpop.f32.mrb[71].mxu0  ;;  %v1688_v19 = vpop.f32.mrb[71].mxu1 }
 0x287   : > { %v1724_v20 = vmax.f32 %v1686_v39, 0.0  ;;  %v2163_v21 = vadd.f32 %v2162_v18, %v2161_v40  ;;  %v1689_v25 = vadd.f32 %v1688_v19, %v1592_v36  ;;  %v1605_v11 = vadd.f32 %v2160_v4, %v1508_v3 }
 0x288   : > { %1742 = vst [vmem:[%s2947_s5 + $0x50] sm:$0xff] %v1726_v38  ;;  %v1727_v56 = vmax.f32 %v1697_v8, 0.0 }
 0x289   : > { %1740 = vst [vmem:[%s2947_s5 + $0x40] sm:$0xff] %v1724_v20  ;;  %v1725_v6 = vmax.f32 %v1689_v25, 0.0  ;;  %v1608_v9 = vadd.f32 %v2163_v21, %v1511_v7 }
 0x28a   : > { %1743 = vst [vmem:[%s2947_s5 + $0x58] sm:$0xff] %v1727_v56 }
 0x28b   : > { %1741 = vst [vmem:[%s2947_s5 + $0x48] sm:$0xff] %v1725_v6  ;;  %v2164_v17 = vpop.f32.mrb[72].mxu0  ;;  %v2312_v10 = vpop.f32.mrb[72].mxu1 }
 0x28c   : > { %v2165_v12 = vpop.f32.mrb[73].mxu0  ;;  %v1701_v62 = vpop.f32.mrb[73].mxu1 }
 0x28d   : > { %v2166_v28 = vadd.f32 %v2165_v12, %v2164_v17  ;;  %v1702_v30 = vadd.f32 %v1701_v62, %v1605_v11  ;;  %v2167_v22 = vpop.f32.mrb[74].mxu0  ;;  %v2313_v24 = vpop.f32.mrb[74].mxu1 }
 0x28e   : > { %v2168_v31 = vpop.f32.mrb[75].mxu0  ;;  %v1704_v32 = vpop.f32.mrb[75].mxu1 }
 0x28f   : > { %v1613_v33 = vadd.f32 %v2166_v28, %v1516_v14  ;;  %v1728_v35 = vmax.f32 %v1702_v30, 0.0  ;;  %v2169_v15 = vadd.f32 %v2168_v31, %v2167_v22  ;;  %v1705_v27 = vadd.f32 %v1704_v32, %v1608_v9 }
 0x291   : > { %v1710_v36 = vadd.f32 %v2312_v10, %v1613_v33  ;;  %1744 = vst [vmem:[%s2947_s5 + $0x60] sm:$0xff] %v1728_v35  ;;  %v1616_v37 = vadd.f32 %v2169_v15, %v1519_v26  ;;  %v1729_v5 = vmax.f32 %v1705_v27, 0.0 }
 0x293   : > { %v1730_v41 = vmax.f32 %v1710_v36, 0.0  ;;  %v1713_v44 = vadd.f32 %v2313_v24, %v1616_v37  ;;  %1745 = vst [vmem:[%s2947_s5 + $0x68] sm:$0xff] %v1729_v5 }
 0x295   : > { %1746 = vst [vmem:[%s2947_s5 + $0x70] sm:$0xff] %v1730_v41  ;;  %v1731_v23 = vmax.f32 %v1713_v44, 0.0 }
 0x297   : > { %1747 = vst [vmem:[%s2947_s5 + $0x78] sm:$0xff] %v1731_v23 }
 0x298 PF: > { %s16_s19 = sadd.s32 1, %s2558_s19   ;;  %s3010_s15 = smov %s2550_s17 }
 0x299   : > { %p13_p8 = scmp.ge.s32.totalorder %s16_s19, 6   ;;  %s3011_s16 = smov %s2554_s18 }
 0x29a   : > { %s3012_s17 = smov %s3015_s21  ;;  %s3013_s18 = smov %s3019_s22 }
 0x29b   :  { %15 = sbr.rel (!%p13_p8) target bundleno = 4 (0x4), region = 86 }
 0x2a2   :  { %1778 = vsyncpa [#allocation4], 1 }
 0x2a3   :  { %1780 = vsyncpa [#allocation4 + $0x1], 1 }
 0x2a4   :  { %1781 = vsyncpa [#allocation6], 1 }

</bundles_post_ra>
